<compile_context>
chip_gen: v7x
topology: tpu7x:2x2x1
jax: 0.10.0
libtpu: 0.0.40
codegen_flags: <defaults>
</compile_context>

<pallas_src>
import functools

import jax
import jax.numpy as jnp
from jax.experimental import pallas as pl
from jax.experimental.pallas import tpu as pltpu


def _round_up(n, m):
    return ((n + m - 1) // m) * m


def _mlp_kernel(x_ref, w1_ref, w2_ref, w3_ref, out_ref, *, fc1_dim, fc2_dim):
    # Layer 1: (x | 1) @ [W1 ; b1]  (bias folded in via the constant-1 lane).
    h1 = jnp.dot(x_ref[...], w1_ref[...], preferred_element_type=jnp.float32)
    h1 = jnp.maximum(h1, 0.0)                                  # ReLU, f32
    # Re-arm the bias lane (a padding column, guaranteed zero here) with 1.0.
    col = jax.lax.broadcasted_iota(jnp.int32, h1.shape, 1)
    h1 = jnp.where(col == fc1_dim, 1.0, h1)

    # Layer 2: (h1 | 1) @ [W2 ; b2]
    h2 = jnp.dot(h1.astype(w2_ref.dtype), w2_ref[...],
                 preferred_element_type=jnp.float32)
    h2 = jnp.maximum(h2, 0.0)
    col = jax.lax.broadcasted_iota(jnp.int32, h2.shape, 1)
    h2 = jnp.where(col == fc2_dim, 1.0, h2)

    # Layer 3: logits (no activation; dropout is identity in eval mode).
    out = jnp.dot(h2.astype(w3_ref.dtype), w3_ref[...],
                  preferred_element_type=jnp.float32)
    out_ref[...] = out.astype(out_ref.dtype)


def _pack_augmented(w, b, pad_in, pad_out, dtype):
    """Pack [W ; b] into a (pad_in, pad_out) lane-dense slab; row `fan_in` = bias."""
    fan_in, fan_out = w.shape
    wa = jnp.zeros((pad_in, pad_out), jnp.float32)
    wa = wa.at[:fan_in, :fan_out].set(w.astype(jnp.float32))
    wa = wa.at[fan_in, :fan_out].set(b.reshape(-1).astype(jnp.float32))
    return wa.astype(dtype)


@functools.partial(jax.jit, static_argnames=("tile_b",))
def mlp_forward(x, w1, b1, w2, b2, w3, b3, *, tile_b=512):
    """Fused 3-layer MLP forward (eval-mode dropout = identity)."""
    batch, input_dim = x.shape
    fc1_dim = w1.shape[1]
    fc2_dim = w2.shape[1]
    out_dim = w3.shape[1]

    mxu_dtype = jnp.bfloat16  # bf16 MXU inputs, f32 accumulation everywhere

    # Lane-dense padded sizes (+1 leaves room for the folded-bias lane/row).
    pad_in = _round_up(input_dim + 1, 128)
    pad_h1 = _round_up(fc1_dim + 1, 128)
    pad_h2 = _round_up(fc2_dim + 1, 128)
    pad_out = _round_up(out_dim, 128)

    # Batch tile: largest of (requested, batch rounded to 8 sublanes).
    tile_b = min(tile_b, _round_up(batch, 8))
    b_pad = _round_up(batch, tile_b)

    # Pack x into a lane-dense slab with a constant-1 bias lane at `input_dim`.
    x_pad = jnp.zeros((b_pad, pad_in), jnp.float32)
    x_pad = x_pad.at[:batch, :input_dim].set(x.astype(jnp.float32))
    x_pad = x_pad.at[:, input_dim].set(1.0)
    x_pad = x_pad.astype(mxu_dtype)

    w1a = _pack_augmented(w1, b1, pad_in, pad_h1, mxu_dtype)
    w2a = _pack_augmented(w2, b2, pad_h1, pad_h2, mxu_dtype)
    w3a = _pack_augmented(w3, b3, pad_h2, pad_out, mxu_dtype)

    grid = (b_pad // tile_b,)
    out = pl.pallas_call(
        functools.partial(_mlp_kernel, fc1_dim=fc1_dim, fc2_dim=fc2_dim),
        out_shape=jax.ShapeDtypeStruct((b_pad, pad_out), jnp.float32),
        grid=grid,
        in_specs=[
            pl.BlockSpec((tile_b, pad_in), lambda i: (i, 0)),    # x: streamed
            pl.BlockSpec((pad_in, pad_h1), lambda i: (0, 0)),    # W1: resident
            pl.BlockSpec((pad_h1, pad_h2), lambda i: (0, 0)),    # W2: resident
            pl.BlockSpec((pad_h2, pad_out), lambda i: (0, 0)),   # W3: resident
        ],
        out_specs=pl.BlockSpec((tile_b, pad_out), lambda i: (i, 0)),
        compiler_params=pltpu.CompilerParams(
            dimension_semantics=("parallel",),   # shard batch tiles across TCs
            vmem_limit_bytes=32 * 1024 * 1024,   # explicit, safe on v5e/v6e/v7x
        ),
    )(x_pad, w1a, w2a, w3a)

    # Strip batch + lane padding (padded output columns are exact zeros anyway).
    return out[:batch, :out_dim]


def _linear_params(key, fan_in, fan_out):
    """Deterministic init mimicking nn.Linear's uniform(-1/sqrt(fan_in), ...)."""
    kw, kb = jax.random.split(key)
    bound = 1.0 / jnp.sqrt(jnp.float32(fan_in))
    w = jax.random.uniform(kw, (fan_in, fan_out), jnp.float32, -bound, bound)
    b = jax.random.uniform(kb, (fan_out,), jnp.float32, -bound, bound)
    return w, b


if __name__ == "__main__":
    # data_config / model_config analogue (small, concrete sizes)
    #   data_config['input_dim'] = (4, 8)    -> input_dim  = 32
    #   data_config['output_dim'] = 4 labels -> output_dim = 4
    #   model_config: fc1_dim = 64, fc2_dim = 32
    batch = 8
    input_dim = 4 * 8
    fc1_dim = 64
    fc2_dim = 32
    output_dim = 4

    root = jax.random.PRNGKey(0)
    kx, k1, k2, k3 = jax.random.split(root, 4)

    x = jax.random.normal(kx, (batch, input_dim), jnp.float32)
    w1, b1 = _linear_params(k1, input_dim, fc1_dim)
    w2, b2 = _linear_params(k2, fc1_dim, fc2_dim)
    w3, b3 = _linear_params(k3, fc2_dim, output_dim)

    out = jax.block_until_ready(mlp_forward(x, w1, b1, w2, b2, w3, b3))
    assert out.shape == (batch, output_dim)

    # Reference 1: same bf16 matmul inputs / f32 accumulation as the kernel.
    bf, f32 = jnp.bfloat16, jnp.float32
    h = jnp.maximum(
        jnp.dot(x.astype(bf), w1.astype(bf), preferred_element_type=f32)
        + b1.astype(bf).astype(f32), 0.0)
    h = jnp.maximum(
        jnp.dot(h.astype(bf), w2.astype(bf), preferred_element_type=f32)
        + b2.astype(bf).astype(f32), 0.0)
    ref_bf16 = (jnp.dot(h.astype(bf), w3.astype(bf), preferred_element_type=f32)
                + b3.astype(bf).astype(f32))
    assert jnp.allclose(out, ref_bf16, atol=2e-3, rtol=2e-3), \
        float(jnp.max(jnp.abs(out - ref_bf16)))

    # Reference 2: pure-f32 math (loose tolerance absorbs bf16 rounding).
    ref = jnp.maximum(x @ w1 + b1, 0.0)
    ref = jnp.maximum(ref @ w2 + b2, 0.0)
    ref = ref @ w3 + b3
    assert jnp.allclose(out, ref, atol=5e-2, rtol=5e-2)

    print("KERNEL_OK")
</pallas_src>

<mosaic_0001>
module attributes {stable_mosaic.version = 11 : i64} {
  func.func @_mlp_kernel(%arg0: i32, %arg1: memref<8x128xbf16, #tpu.memory_space<vmem>>, %arg2: memref<128x128xbf16, #tpu.memory_space<vmem>>, %arg3: memref<128x128xbf16, #tpu.memory_space<vmem>>, %arg4: memref<128x128xbf16, #tpu.memory_space<vmem>>, %arg5: memref<8x128xf32, #tpu.memory_space<vmem>>) attributes {dimension_semantics = [#tpu.dimension_semantics<parallel>], iteration_bounds = array<i64: 1>, scalar_prefetch = 0 : i64, scratch_operands = 0 : i64, tpu.core_type = #tpu.core_type<tc>, window_params = [{transform_indices = @transform_0, window_bounds = array<i64: 8, 128>}, {pipeline_mode = #tpu.pipeline_mode<synchronous>, transform_indices = @transform_1, window_bounds = array<i64: 128, 128>}, {pipeline_mode = #tpu.pipeline_mode<synchronous>, transform_indices = @transform_2, window_bounds = array<i64: 128, 128>}, {pipeline_mode = #tpu.pipeline_mode<synchronous>, transform_indices = @transform_3, window_bounds = array<i64: 128, 128>}, {transform_indices = @transform_4, window_bounds = array<i64: 8, 128>}]} {
    %c0 = arith.constant 0 : index
    %c0_0 = arith.constant 0 : index
    %0 = vector.load %arg1[%c0, %c0_0] : memref<8x128xbf16, #tpu.memory_space<vmem>>, vector<8x128xbf16>
    %c0_1 = arith.constant 0 : index
    %c0_2 = arith.constant 0 : index
    %1 = vector.load %arg2[%c0_1, %c0_2] : memref<128x128xbf16, #tpu.memory_space<vmem>>, vector<128x128xbf16>
    %cst = arith.constant dense<0.000000e+00> : vector<8x128xf32>
    %2 = tpu.matmul %0, %1, %cst {dimension_numbers = #tpu.dot_dimension_numbers<[1], [0], [0], [1], [0, 0, 1, 1], [], []>} : vector<8x128xbf16>, vector<128x128xbf16>, vector<8x128xf32> -> vector<8x128xf32>
    %cst_3 = arith.constant 0.000000e+00 : f32
    %3 = vector.broadcast %cst_3 : f32 to vector<8x128xf32>
    %4 = arith.maximumf %2, %3 : vector<8x128xf32>
    %5 = tpu.iota {dimensions = array<i32: 1>} : vector<8x128xi32>
    %c64_i32 = arith.constant 64 : i32
    %6 = vector.broadcast %c64_i32 : i32 to vector<8x128xi32>
    %7 = arith.cmpi eq, %5, %6 : vector<8x128xi32>
    %cst_4 = arith.constant 1.000000e+00 : f32
    %8 = vector.broadcast %cst_4 : f32 to vector<8x128xf32>
    %9 = arith.select %7, %8, %4 : vector<8x128xi1>, vector<8x128xf32>
    %10 = arith.truncf %9 : vector<8x128xf32> to vector<8x128xbf16>
    %c0_5 = arith.constant 0 : index
    %c0_6 = arith.constant 0 : index
    %11 = vector.load %arg3[%c0_5, %c0_6] : memref<128x128xbf16, #tpu.memory_space<vmem>>, vector<128x128xbf16>
    %cst_7 = arith.constant dense<0.000000e+00> : vector<8x128xf32>
    %12 = tpu.matmul %10, %11, %cst_7 {dimension_numbers = #tpu.dot_dimension_numbers<[1], [0], [0], [1], [0, 0, 1, 1], [], []>} : vector<8x128xbf16>, vector<128x128xbf16>, vector<8x128xf32> -> vector<8x128xf32>
    %cst_8 = arith.constant 0.000000e+00 : f32
    %13 = vector.broadcast %cst_8 : f32 to vector<8x128xf32>
    %14 = arith.maximumf %12, %13 : vector<8x128xf32>
    %15 = tpu.iota {dimensions = array<i32: 1>} : vector<8x128xi32>
    %c32_i32 = arith.constant 32 : i32
    %16 = vector.broadcast %c32_i32 : i32 to vector<8x128xi32>
    %17 = arith.cmpi eq, %15, %16 : vector<8x128xi32>
    %cst_9 = arith.constant 1.000000e+00 : f32
    %18 = vector.broadcast %cst_9 : f32 to vector<8x128xf32>
    %19 = arith.select %17, %18, %14 : vector<8x128xi1>, vector<8x128xf32>
    %20 = arith.truncf %19 : vector<8x128xf32> to vector<8x128xbf16>
    %c0_10 = arith.constant 0 : index
    %c0_11 = arith.constant 0 : index
    %21 = vector.load %arg4[%c0_10, %c0_11] : memref<128x128xbf16, #tpu.memory_space<vmem>>, vector<128x128xbf16>
    %cst_12 = arith.constant dense<0.000000e+00> : vector<8x128xf32>
    %22 = tpu.matmul %20, %21, %cst_12 {dimension_numbers = #tpu.dot_dimension_numbers<[1], [0], [0], [1], [0, 0, 1, 1], [], []>} : vector<8x128xbf16>, vector<128x128xbf16>, vector<8x128xf32> -> vector<8x128xf32>
    %c0_13 = arith.constant 0 : index
    %c0_14 = arith.constant 0 : index
    %23 = vector.load %arg5[%c0_13, %c0_14] : memref<8x128xf32, #tpu.memory_space<vmem>>, vector<8x128xf32>
    tpu.vector_store %arg5[%c0_13, %c0_14], %22 {strides = array<i32>} : memref<8x128xf32, #tpu.memory_space<vmem>>, vector<8x128xf32>,
    return
  }
  func.func @transform_0(%arg0: i32) -> (i32, i32) {
    %c0_i32 = arith.constant 0 : i32
    %c0_i32_0 = arith.constant 0 : i32
    return %arg0, %c0_i32 : i32, i32
  }
  func.func @transform_1(%arg0: i32) -> (i32, i32) {
    %c0_i32 = arith.constant 0 : i32
    %c0_i32_0 = arith.constant 0 : i32
    %c0_i32_1 = arith.constant 0 : i32
    return %c0_i32, %c0_i32_0 : i32, i32
  }
  func.func @transform_2(%arg0: i32) -> (i32, i32) {
    %c0_i32 = arith.constant 0 : i32
    %c0_i32_0 = arith.constant 0 : i32
    %c0_i32_1 = arith.constant 0 : i32
    return %c0_i32, %c0_i32_0 : i32, i32
  }
  func.func @transform_3(%arg0: i32) -> (i32, i32) {
    %c0_i32 = arith.constant 0 : i32
    %c0_i32_0 = arith.constant 0 : i32
    %c0_i32_1 = arith.constant 0 : i32
    return %c0_i32, %c0_i32_0 : i32, i32
  }
  func.func @transform_4(%arg0: i32) -> (i32, i32) {
    %c0_i32 = arith.constant 0 : i32
    %c0_i32_0 = arith.constant 0 : i32
    return %arg0, %c0_i32 : i32, i32
  }
}

</mosaic_0001>

<bundles_post_ra>
// kernel: mlp_forward.1
= control target key start
LH: loop header
LB: loop body
LE: loop exit
PB: predicated region body
PF: predicated region fallthrough
CT: control target
= control target key end

     0   :  { %v483_v0 = vmov 0.0   ;;  %vm484_vm0 = vmmov 0   ;;  %v124_v25 = vlaneseq  ;;  %s618_s1 = inlined_call_operand.vmem [shape: bf16[128,128], index: 1, kind: input, shape index: {}]   ;;  %s619_s2 = inlined_call_operand.vmem [shape: bf16[128,128], index: 2, kind: input, shape index: {}]   ;;  %s620_s0 = inlined_call_operand.vmem [shape: bf16[8,128], index: 0, kind: input, shape index: {}]   ;;  %s621_s3 = inlined_call_operand.vmem [shape: bf16[128,128], index: 3, kind: input, shape index: {}]   ;;  %s622_s4 = inlined_call_operand.vmem [shape: f32[8,128], index: 4, kind: output, shape index: {}]  }
   0x1   :  { %397 = vmatprep.subr.bf16.mxu0 %v483_v0  ;;  %v459_v1 = vld [vmem:[%s618_s1] sm:$0xff]   ;;  %413 = vmatprep.mubr.msk.bf16.mxu0 %vm484_vm0, %v483_v0  ;;  %v460_v2 = vld [vmem:[%s618_s1 + $0x8] sm:$0xff]   ;;  %v461_v3 = vld [vmem:[%s618_s1 + $0x10] sm:$0xff]  }
   0x2   :  { %417 = vmatprep.subr.bf16.mxu1 %v483_v0  ;;  %433 = vmatprep.mubr.msk.bf16.mxu1 %vm484_vm0, %v483_v0  ;;  %v467_v4 = vld [vmem:[%s619_s2] sm:$0xff]   ;;  %v462_v5 = vld [vmem:[%s618_s1 + $0x18] sm:$0xff]   ;;  %v468_v6 = vld [vmem:[%s619_s2 + $0x8] sm:$0xff]   ;;  %v125_v26 = vand.u32 127, %v124_v25 }
   0x3   :  { %398 = vmatpush3.bf16.msra.mxu0 %v459_v1  ;;  %418 = vmatpush3.bf16.msra.mxu1 %v467_v4  ;;  %v463_v7 = vld [vmem:[%s618_s1 + $0x20] sm:$0xff]   ;;  %v469_v8 = vld [vmem:[%s619_s2 + $0x10] sm:$0xff]   ;;  %v464_v9 = vld [vmem:[%s618_s1 + $0x28] sm:$0xff]  }
   0x4   :  { %399 = vmatprep.subr.bf16.mxu0 %v483_v0  ;;  %419 = vmatprep.subr.bf16.mxu1 %v483_v0  ;;  %v470_v10 = vld [vmem:[%s619_s2 + $0x18] sm:$0xff]   ;;  %v465_v11 = vld [vmem:[%s618_s1 + $0x30] sm:$0xff]   ;;  %v471_v12 = vld [vmem:[%s619_s2 + $0x20] sm:$0xff]   ;;  %vm126_vm1 = vcmp.eq.s32.totalorder %v125_v26, 64  ;;  %vm234_vm2 = vcmp.eq.s32.totalorder %v125_v26, 32 }
   0x5   :  { %v466_v13 = vld [vmem:[%s618_s1 + $0x38] sm:$0xff]   ;;  %v472_v14 = vld [vmem:[%s619_s2 + $0x28] sm:$0xff]   ;;  %v18_v15 = vld [vmem:[%s620_s0] sm:$0xf] }
   0x6   :  { %v473_v16 = vld [vmem:[%s619_s2 + $0x30] sm:$0xff]   ;;  %v474_v17 = vld [vmem:[%s619_s2 + $0x38] sm:$0xff]   ;;  %v475_v18 = vld [vmem:[%s621_s3] sm:$0xff]  }
   0x7   :  { %400 = vmatpush3.bf16.msra.mxu0 %v460_v2  ;;  %420 = vmatpush3.bf16.msra.mxu1 %v468_v6  ;;  %v476_v19 = vld [vmem:[%s621_s3 + $0x8] sm:$0xff]   ;;  %v477_v20 = vld [vmem:[%s621_s3 + $0x10] sm:$0xff]   ;;  %v478_v21 = vld [vmem:[%s621_s3 + $0x18] sm:$0xff]  }
   0x8   :  { %401 = vmatprep.subr.bf16.mxu0 %v483_v0  ;;  %421 = vmatprep.subr.bf16.mxu1 %v483_v0  ;;  %v479_v22 = vld [vmem:[%s621_s3 + $0x20] sm:$0xff]   ;;  %v480_v23 = vld [vmem:[%s621_s3 + $0x28] sm:$0xff]   ;;  %v481_v24 = vld [vmem:[%s621_s3 + $0x30] sm:$0xff]  }
   0x9   :  { %v482_v34 = vld [vmem:[%s621_s3 + $0x38] sm:$0xff]  }
   0xb   :  { %402 = vmatpush3.bf16.msra.mxu0 %v461_v3  ;;  %422 = vmatpush3.bf16.msra.mxu1 %v469_v8 }
   0xc   :  { %403 = vmatprep.subr.bf16.mxu0 %v483_v0  ;;  %423 = vmatprep.subr.bf16.mxu1 %v483_v0 }
   0xf   :  { %404 = vmatpush3.bf16.msra.mxu0 %v462_v5  ;;  %424 = vmatpush3.bf16.msra.mxu1 %v470_v10 }
  0x10   :  { %405 = vmatprep.subr.bf16.mxu0 %v483_v0  ;;  %425 = vmatprep.subr.bf16.mxu1 %v483_v0 }
  0x13   :  { %406 = vmatpush3.bf16.msra.mxu0 %v463_v7  ;;  %426 = vmatpush3.bf16.msra.mxu1 %v471_v12 }
  0x14   :  { %407 = vmatprep.subr.bf16.mxu0 %v483_v0  ;;  %427 = vmatprep.subr.bf16.mxu1 %v483_v0 }
  0x17   :  { %408 = vmatpush3.bf16.msra.mxu0 %v464_v9  ;;  %428 = vmatpush3.bf16.msra.mxu1 %v472_v14 }
  0x18   :  { %409 = vmatprep.subr.bf16.mxu0 %v483_v0  ;;  %429 = vmatprep.subr.bf16.mxu1 %v483_v0 }
  0x1b   :  { %410 = vmatpush3.bf16.msra.mxu0 %v465_v11  ;;  %430 = vmatpush3.bf16.msra.mxu1 %v473_v16 }
  0x1c   :  { %411 = vmatprep.subr.bf16.mxu0 %v483_v0  ;;  %431 = vmatprep.subr.bf16.mxu1 %v483_v0 }
  0x1f   :  { %412 = vmatpush3.bf16.msra.mxu0 %v466_v13  ;;  %432 = vmatpush3.bf16.msra.mxu1 %v474_v17 }
  0x20   :  { %437 = vmatprep.subr.bf16.mxu0 %v483_v0 }
  0x22   :  { %414 = vmatmul.mubr.bf16.vlgmr.msra.gmra.mrb[0].mxu0 %v18_v15 }
  0x23   :  { %453 = vmatprep.mubr.msk.bf16.mxu0 %vm484_vm0, %v483_v0  ;;  %438 = vmatpush3.bf16.msra.mxu0 %v475_v18 }
  0x24   :  { %439 = vmatprep.subr.bf16.mxu0 %v483_v0 }
  0x27   :  { %440 = vmatpush3.bf16.msra.mxu0 %v476_v19 }
  0x28   :  { %441 = vmatprep.subr.bf16.mxu0 %v483_v0 }
  0x2b   :  { %442 = vmatpush3.bf16.msra.mxu0 %v477_v20 }
  0x2c   :  { %443 = vmatprep.subr.bf16.mxu0 %v483_v0 }
  0x2f   :  { %444 = vmatpush3.bf16.msra.mxu0 %v478_v21 }
  0x30   :  { %445 = vmatprep.subr.bf16.mxu0 %v483_v0 }
  0x33   :  { %446 = vmatpush3.bf16.msra.mxu0 %v479_v22 }
  0x34   :  { %447 = vmatprep.subr.bf16.mxu0 %v483_v0 }
  0x37   :  { %448 = vmatpush3.bf16.msra.mxu0 %v480_v23 }
  0x38   :  { %449 = vmatprep.subr.bf16.mxu0 %v483_v0 }
  0x3b   :  { %450 = vmatpush3.bf16.msra.mxu0 %v481_v24 }
  0x3c   :  { %451 = vmatprep.subr.bf16.mxu0 %v483_v0 }
  0x3f   :  { %452 = vmatpush3.bf16.msra.mxu0 %v482_v34 }
  0xf5   :  { %v117_v27 = vpop.f32.mrb[0].mxu0 }
  0xf6   :  { %v123_v28 = vmax.f32 %v117_v27, 0.0  ;;  %v415_v29 = vpop.f32.mrb[1].mxu0 }
  0xf7   :  { %v120_v30 = vpop.f32.mrb[2].mxu0 }
  0xf8   :  { %v127_v31 = vsel %vm126_vm1, 1.0, %v123_v28  ;;  %v416_v32 = vpop.f32.mrb[3].mxu0 }
  0xf9   :  { %v128_v33 = vpack.c.bf16 %v127_v31, %v127_v31 }
  0xfb   :  { %434 = vmatmul.mubr.bf16.vlgmr.msra.gmra.mrb[0].mxu1 %v128_v33 }
 0x1ce   :  { %v227_v35 = vpop.f32.mrb[0].mxu1 }
 0x1cf   :  { %v233_v36 = vmax.f32 %v227_v35, 0.0  ;;  %v435_v37 = vpop.f32.mrb[1].mxu1 }
 0x1d0   :  { %v230_v38 = vpop.f32.mrb[2].mxu1 }
 0x1d1   :  { %v235_v39 = vsel %vm234_vm2, 1.0, %v233_v36  ;;  %v436_v40 = vpop.f32.mrb[3].mxu1 }
 0x1d2   :  { %v236_v41 = vpack.c.bf16 %v235_v39, %v235_v39 }
 0x1d4   :  { %454 = vmatmul.mubr.bf16.vlgmr.msra.gmra.mrb[4].mxu0 %v236_v41 }
 0x2a7   :  { %v335_v42 = vpop.f32.mrb[4].mxu0 }
 0x2a8   :  { %341 = vst [vmem:[%s622_s4] sm:$0xff] %v335_v42  ;;  %v455_v43 = vpop.f32.mrb[5].mxu0 }
 0x2a9   :  { %v338_v44 = vpop.f32.mrb[6].mxu0 }
 0x2aa   :  { %v456_v45 = vpop.f32.mrb[7].mxu0 }

</bundles_post_ra>
